<compile_context>
chip_gen: v6e
topology: v6e:2x2x1
jax: 0.10.0
libtpu: 0.0.40
codegen_flags: <defaults>
</compile_context>

<pallas_src>
import functools

import jax
import jax.numpy as jnp
from jax import lax
from jax.experimental import pallas as pl
from jax.experimental.pallas import tpu as pltpu


# bf16 matmul inputs (f32 accumulation) per the review for v6e/v7x; v5e MXU is
# also bf16-native.  Set to jnp.float32 to recover bit-exact f32 splats.
MXU_DTYPE = jnp.bfloat16


# ----------------------------- Pallas kernels ------------------------------

def _density_kernel(cx_ref, cy_ref, x_ref, y_ref, img_ref, *,
                    inv_two_sigma2, mxu_dtype):
    # cx_ref/cy_ref: VMEM (Bb, 1, P) f32 curve-point tables
    # x_ref/y_ref  : VMEM (n_px, 1) f32 pixel coordinates (hoisted to wrapper)
    # img_ref      : VMEM (Bb, n_px, n_px) f32 output block
    X = x_ref[...]                       # (n_px, 1)
    Y = y_ref[...]
    cx = cx_ref[...]                     # (Bb, 1, P)
    cy = cy_ref[...]

    # Separable Gaussian tables: gx[b, i, p] = exp(-k * (X[i] - cx[b, p])^2)
    dx = X[None, :, :] - cx              # (1, n_px, 1) - (Bb, 1, P) -> (Bb, n_px, P)
    dy = Y[None, :, :] - cy
    gx = jnp.exp(-(dx * dx) * inv_two_sigma2).astype(mxu_dtype)   # exp in f32 (EUP)
    gy = jnp.exp(-(dy * dy) * inv_two_sigma2).astype(mxu_dtype)

    # img[b, i, j] = sum_p gx[b, i, p] * gy[b, j, p]   -> batched MXU matmul
    # TODO(synk): density_comp is not shipped with the module; an unnormalized
    # Gaussian-splat density is used here.
    img_ref[...] = jnp.einsum('bip,bjp->bij', gx, gy,
                              preferred_element_type=jnp.float32)


def _choose_block_b(B, n_px, bytes_budget=8 << 20):
    """Images per grid step: amortize step overhead while keeping the
    double-buffered f32 output block well under the 32 MiB scoped-VMEM
    default (safe on v7x's smaller VMEM as well)."""
    per_img = 2 * n_px * n_px * 4        # double-buffered output image bytes
    bb = max(1, min(B, bytes_budget // per_img))
    while B % bb:                        # grid needs an exact divisor
        bb -= 1
    return bb


def density_images_pallas(curve_xy, *, n_px, x_liminf, x_limsup,
                          y_liminf, y_limsup, sigma, block_b=None,
                          mxu_dtype=MXU_DTYPE):
    """curve_xy: (B, P, 2) projected curve points -> (B, n_px, n_px) images."""
    B, P, _ = curve_xy.shape
    cx = curve_xy[:, :, 0].astype(jnp.float32)[:, None, :]     # (B, 1, P)
    cy = curve_xy[:, :, 1].astype(jnp.float32)[:, None, :]
    # torch.linspace-equivalent pixel coordinates, hoisted out of the kernel.
    X = jnp.linspace(x_liminf, x_limsup, n_px, dtype=jnp.float32)[:, None]  # (n_px, 1)
    Y = jnp.linspace(y_liminf, y_limsup, n_px, dtype=jnp.float32)[:, None]

    Bb = _choose_block_b(B, n_px) if block_b is None else block_b
    kern = functools.partial(
        _density_kernel,
        inv_two_sigma2=float(1.0 / (2.0 * sigma * sigma)),
        mxu_dtype=mxu_dtype)

    return pl.pallas_call(
        kern,
        out_shape=jax.ShapeDtypeStruct((B, n_px, n_px), jnp.float32),
        grid=(B // Bb,),
        in_specs=[pl.BlockSpec((Bb, 1, P), lambda b: (b, 0, 0)),
                  pl.BlockSpec((Bb, 1, P), lambda b: (b, 0, 0)),
                  pl.BlockSpec((n_px, 1), lambda b: (0, 0)),
                  pl.BlockSpec((n_px, 1), lambda b: (0, 0))],
        out_specs=pl.BlockSpec((Bb, n_px, n_px), lambda b: (b, 0, 0)),
        compiler_params=pltpu.CompilerParams(
            dimension_semantics=("parallel",)),
    )(cx, cy, X, Y)


# ------------------------- chain geometry (JAX glue) ------------------------

def _rz(t):
    c, s = jnp.cos(t), jnp.sin(t)
    z, o = jnp.zeros_like(t), jnp.ones_like(t)
    return jnp.stack([jnp.stack([c, -s, z], -1),
                      jnp.stack([s,  c, z], -1),
                      jnp.stack([z,  z, o], -1)], -2)


def _ry(t):
    c, s = jnp.cos(t), jnp.sin(t)
    z, o = jnp.zeros_like(t), jnp.ones_like(t)
    return jnp.stack([jnp.stack([c,  z, s], -1),
                      jnp.stack([z,  o, z], -1),
                      jnp.stack([-s, z, c], -1)], -2)


# TODO(synk): rotation_from_params / R_from_angles are not shipped with the
# module; standard Euler (ZYZ) and Rz(Psi)@Ry(Theta) conventions are used.
def rotation_from_params(orientations):
    a, b, c = orientations[:, 0], orientations[:, 1], orientations[:, 2]
    return _rz(a) @ _ry(b) @ _rz(c)                      # (B, 3, 3)


def R_from_angles(Psi, Theta):
    return _rz(Psi) @ _ry(Theta)                         # (B, NA, 3, 3)


def ctf_apply(clean_imgs, Df, side, ctf_feat):
    # TODO(synk): FFT has no Pallas equivalent; CTF filtering done in plain JAX
    # (standard cryo-EM CTF, centered FFT conventions).
    D = clean_imgs.shape[-1]
    kV, Cs = ctf_feat['kV'], ctf_feat['Cs']
    alpha, Bf, ph = ctf_feat['alpha'], ctf_feat['B_factor'], ctf_feat['phase_shift']
    fr = jnp.fft.fftshift(jnp.fft.fftfreq(D, d=side / D)).astype(jnp.float32)
    fx, fy = jnp.meshgrid(fr, fr, indexing='ij')
    s2 = fx ** 2 + fy ** 2
    volt = kV * 1e3
    lam = 12.2639 / jnp.sqrt(volt + 0.97845e-6 * volt ** 2)
    gamma = (2.0 * jnp.pi * (-0.5 * Df[:, None, None] * lam * s2
                             + 0.25 * Cs * 1e7 * lam ** 3 * s2 ** 2) - ph)
    filt = jnp.sqrt(1.0 - alpha ** 2) * jnp.sin(gamma) - alpha * jnp.cos(gamma)
    filt = filt * jnp.exp(-Bf / 4.0 * s2)
    f = jnp.fft.fftshift(jnp.fft.fft2(
        jnp.fft.ifftshift(clean_imgs, axes=(-2, -1))), axes=(-2, -1))
    out = jnp.fft.ifft2(jnp.fft.ifftshift(filt * f, axes=(-2, -1)))
    out = jnp.fft.fftshift(out, axes=(-2, -1))
    return jnp.abs(out)


class ModelChain:
    """JAX/Pallas port of model_chain (forward == CT_images with CTF)."""

    def __init__(self, feats, key):
        self.Psi = feats['Psi_init']            # (NA,)
        self.Theta = feats['Theta_init']        # (NA,)
        self.dists = feats['dists']             # (NA+1, 1)
        self.ref_idx = feats['ref_idx']
        self.img_lims = feats['img_lims']       # (x_sup, x_inf, y_sup, y_inf)
        self.n_px = feats['n_px']
        self.sigma = feats['sigma_density']
        self.density_type = feats['density_type']
        self.CTF_feat = feats['CTF_feat']
        self.param_idxs = list(feats['param_idxs'])
        self.idx = jnp.asarray(self.param_idxs, jnp.int32)
        n_eig = feats['n_eigenval']
        npar = len(self.param_idxs)
        self.npar = npar
        # Reference __init__ zero-inits the Linear weights; deterministic small
        # random values are used here so the kernel exercises real geometry.
        k1, k2 = jax.random.split(key)
        W_psi = 0.1 * jax.random.normal(k1, (npar, n_eig), jnp.float32)
        W_theta = 0.1 * jax.random.normal(k2, (npar, n_eig), jnp.float32)
        # Hoisted: pre-concatenate + pre-transpose the fused Gamma weight
        # (review item) -> forward does a single (B, E) @ (E, 2*npar) dot.
        self.Wt_cat = jnp.concatenate([W_psi, W_theta], axis=0).T  # (E, 2*npar)

    def discrete_curve(self, Psi_diff, Theta_diff, orientations, x0s):
        F0 = rotation_from_params(orientations)                 # (B,3,3)
        Psi = self.Psi[None, :] + Psi_diff
        Theta = self.Theta[None, :] + Theta_diff
        R = R_from_angles(Psi, Theta)                           # (B,NA,3,3)
        ref = self.ref_idx
        x0 = x0s[:, None, :]                                    # (B,1,3)
        dists = self.dists[None]                                # (1,NA+1,1)

        dff = [F0]
        for i in range(R.shape[1] - ref):
            dff.append(jnp.einsum('bij,bjk->bik', R[:, ref + i], dff[-1]))
        DFF_forward = jnp.stack(dff, axis=1)                    # (B, NA-ref+1, 3, 3)
        Gamma = jnp.concatenate(
            [x0, DFF_forward[:, :, 2] * dists[:, ref:, :]], axis=1)
        Gamma = jnp.cumsum(Gamma, axis=1)

        if ref > 0:
            dffb = [-jnp.einsum('bji,bjk->bik', R[:, ref - 1], F0)]   # -R^T @ F0
            for i in range(ref - 1):
                r = R[:, ref - 2 - i]
                dffb.append(jnp.einsum('bji,bjk->bik', r, dffb[-1]))
            DFF_backward = jnp.stack(dffb, axis=1)              # (B, ref, 3, 3)
            seg_b = DFF_backward[:, :, 2] * jnp.flip(dists[:, :ref, :], axis=1)
            Gamma_backward = x0 + jnp.flip(jnp.cumsum(seg_b, axis=1), axis=1)
            Gamma = jnp.concatenate([Gamma_backward, Gamma], axis=1)
        return Gamma                                            # (B, NA+2, 3)

    def forward(self, inputs):
        V = inputs[:, :-7].astype(jnp.float32)
        orientations = inputs[:, -7:-4]
        x0s = inputs[:, -4:-1]
        Df = inputs[:, -1]
        B = V.shape[0]
        NA = self.Psi.shape[0]
        npar = self.npar

        # Review: at these sizes a Pallas matmul pads to (8,128) MXU tiles for
        # ~0% utilization; plain jnp.dot lets XLA fuse it.
        # TODO(synk): for production B/n_eig/npar, swap in a tiled Pallas MXU
        # matmul (128-multiple blocks, ("parallel","parallel","arbitrary")).
        diffs = jnp.dot(V, self.Wt_cat, preferred_element_type=jnp.float32)
        Psi_diffs = jnp.zeros((B, NA), jnp.float32).at[:, self.idx].set(diffs[:, :npar])
        Theta_diffs = jnp.zeros((B, NA), jnp.float32).at[:, self.idx].set(diffs[:, npar:])

        Gamma = self.discrete_curve(Psi_diffs, Theta_diffs, orientations, x0s)
        curve_proj = Gamma[:, :, :-1]                           # drop z -> (B, P, 2)

        x_limsup, x_liminf, y_limsup, y_liminf = self.img_lims
        clean = density_images_pallas(
            curve_proj, n_px=self.n_px,
            x_liminf=x_liminf, x_limsup=x_limsup,
            y_liminf=y_liminf, y_limsup=y_limsup,
            sigma=self.sigma)                                   # (B, n_px, n_px)

        side = x_limsup - x_liminf                              # X[-1] - X[0]
        return ctf_apply(clean, Df, side, self.CTF_feat)


# ----------------------------------- demo -----------------------------------

if __name__ == "__main__":
    key = jax.random.PRNGKey(0)
    NA, ref_idx, n_eig, n_px, B = 6, 2, 4, 32, 2
    param_idxs = [0, 2, 3, 5]

    k_feat, k_param, k_in = jax.random.split(key, 3)
    kp, kt = jax.random.split(k_feat)
    feats = dict(
        Psi_init=0.3 * jax.random.normal(kp, (NA,), jnp.float32),
        Theta_init=0.3 * jax.random.normal(kt, (NA,), jnp.float32),
        dists=0.25 * jnp.ones((NA + 1, 1), jnp.float32),
        ref_idx=ref_idx,
        img_lims=(1.0, -1.0, 1.0, -1.0),   # (x_limsup, x_liminf, y_limsup, y_liminf)
        n_px=n_px,
        sigma_density=0.15,
        density_type='gaussian',
        CTF_feat=dict(kV=300.0, Cs=2.7, alpha=0.1, B_factor=0.0, phase_shift=0.0),
        param_idxs=param_idxs,
        n_eigenval=n_eig,
    )
    model = ModelChain(feats, k_param)

    V = jax.random.normal(k_in, (B, n_eig), jnp.float32)
    orientations = jnp.array([[0.2, 0.4, -0.1], [-0.3, 0.1, 0.5]], jnp.float32)
    x0s = jnp.array([[0.1, -0.2, 0.0], [-0.1, 0.15, 0.05]], jnp.float32)
    Df = jnp.array([15000.0, 18000.0], jnp.float32)
    inputs = jnp.concatenate([V, orientations, x0s, Df[:, None]], axis=1)  # (B, n_eig+7)

    fwd = jax.jit(model.forward)
    out = jax.block_until_ready(fwd(inputs))
    assert out.shape == (B, n_px, n_px), out.shape
    assert bool(jnp.all(jnp.isfinite(out)))
    print("KERNEL_OK")
</pallas_src>

<mosaic_0001>
module attributes {stable_mosaic.version = 11 : i64} {
  func.func @_density_kernel(%arg0: i32, %arg1: memref<2x1x8xf32, #tpu.memory_space<vmem>>, %arg2: memref<2x1x8xf32, #tpu.memory_space<vmem>>, %arg3: memref<32x1xf32, #tpu.memory_space<vmem>>, %arg4: memref<32x1xf32, #tpu.memory_space<vmem>>, %arg5: memref<2x32x32xf32, #tpu.memory_space<vmem>>) attributes {dimension_semantics = [#tpu.dimension_semantics<parallel>], iteration_bounds = array<i64: 1>, scalar_prefetch = 0 : i64, scratch_operands = 0 : i64, tpu.core_type = #tpu.core_type<tc>, window_params = [{transform_indices = @transform_0, window_bounds = array<i64: 2, 1, 8>}, {transform_indices = @transform_1, window_bounds = array<i64: 2, 1, 8>}, {pipeline_mode = #tpu.pipeline_mode<synchronous>, transform_indices = @transform_2, window_bounds = array<i64: 32, 1>}, {pipeline_mode = #tpu.pipeline_mode<synchronous>, transform_indices = @transform_3, window_bounds = array<i64: 32, 1>}, {transform_indices = @transform_4, window_bounds = array<i64: 2, 32, 32>}]} {
    %c0 = arith.constant 0 : index
    %c0_0 = arith.constant 0 : index
    %0 = vector.load %arg3[%c0, %c0_0] : memref<32x1xf32, #tpu.memory_space<vmem>>, vector<32x1xf32>
    %c0_1 = arith.constant 0 : index
    %c0_2 = arith.constant 0 : index
    %1 = vector.load %arg4[%c0_1, %c0_2] : memref<32x1xf32, #tpu.memory_space<vmem>>, vector<32x1xf32>
    %c0_3 = arith.constant 0 : index
    %c0_4 = arith.constant 0 : index
    %c0_5 = arith.constant 0 : index
    %2 = vector.load %arg1[%c0_3, %c0_4, %c0_5] : memref<2x1x8xf32, #tpu.memory_space<vmem>>, vector<2x1x8xf32>
    %c0_6 = arith.constant 0 : index
    %c0_7 = arith.constant 0 : index
    %c0_8 = arith.constant 0 : index
    %3 = vector.load %arg2[%c0_6, %c0_7, %c0_8] : memref<2x1x8xf32, #tpu.memory_space<vmem>>, vector<2x1x8xf32>
    %4 = vector.shape_cast %0 : vector<32x1xf32> to vector<1x32x1xf32>
    %5 = vector.broadcast %4 : vector<1x32x1xf32> to vector<2x32x8xf32>
    %6 = vector.broadcast %2 : vector<2x1x8xf32> to vector<2x32x8xf32>
    %7 = arith.subf %5, %6 : vector<2x32x8xf32>
    %8 = vector.shape_cast %1 : vector<32x1xf32> to vector<1x32x1xf32>
    %9 = vector.broadcast %8 : vector<1x32x1xf32> to vector<2x32x8xf32>
    %10 = vector.broadcast %3 : vector<2x1x8xf32> to vector<2x32x8xf32>
    %11 = arith.subf %9, %10 : vector<2x32x8xf32>
    %12 = arith.mulf %7, %7 : vector<2x32x8xf32>
    %cst = arith.constant 0.000000e+00 : f32
    %13 = vector.broadcast %cst : f32 to vector<2x32x8xf32>
    %14 = arith.subf %13, %12 : vector<2x32x8xf32>
    %cst_9 = arith.constant 22.2222214 : f32
    %15 = vector.broadcast %cst_9 : f32 to vector<2x32x8xf32>
    %16 = arith.mulf %14, %15 : vector<2x32x8xf32>
    %17 = math.exp %16 : vector<2x32x8xf32>
    %18 = arith.truncf %17 : vector<2x32x8xf32> to vector<2x32x8xbf16>
    %19 = arith.mulf %11, %11 : vector<2x32x8xf32>
    %cst_10 = arith.constant 0.000000e+00 : f32
    %20 = vector.broadcast %cst_10 : f32 to vector<2x32x8xf32>
    %21 = arith.subf %20, %19 : vector<2x32x8xf32>
    %cst_11 = arith.constant 22.2222214 : f32
    %22 = vector.broadcast %cst_11 : f32 to vector<2x32x8xf32>
    %23 = arith.mulf %21, %22 : vector<2x32x8xf32>
    %24 = math.exp %23 : vector<2x32x8xf32>
    %25 = arith.truncf %24 : vector<2x32x8xf32> to vector<2x32x8xbf16>
    "tpu.trace_start"() <{level = 10 : i32, message = "bip,bjp->bij"}> : () -> ()
    %cst_12 = arith.constant dense<0.000000e+00> : vector<2x32x32xf32>
    %26 = tpu.matmul %18, %25, %cst_12 {dimension_numbers = #tpu.dot_dimension_numbers<[2], [2], [1], [1], [0, 0, 0, 1, 1, 1], [0], [0]>} : vector<2x32x8xbf16>, vector<2x32x8xbf16>, vector<2x32x32xf32> -> vector<2x32x32xf32>
    "tpu.trace_stop"() : () -> ()
    %c0_13 = arith.constant 0 : index
    %c0_14 = arith.constant 0 : index
    %c0_15 = arith.constant 0 : index
    %27 = vector.load %arg5[%c0_13, %c0_14, %c0_15] : memref<2x32x32xf32, #tpu.memory_space<vmem>>, vector<2x32x32xf32>
    tpu.vector_store %arg5[%c0_13, %c0_14, %c0_15], %26 {strides = array<i32>} : memref<2x32x32xf32, #tpu.memory_space<vmem>>, vector<2x32x32xf32>,
    return
  }
  func.func @transform_0(%arg0: i32) -> (i32, i32, i32) {
    %c0_i32 = arith.constant 0 : i32
    %c0_i32_0 = arith.constant 0 : i32
    %c0_i32_1 = arith.constant 0 : i32
    return %arg0, %c0_i32, %c0_i32_0 : i32, i32, i32
  }
  func.func @transform_1(%arg0: i32) -> (i32, i32, i32) {
    %c0_i32 = arith.constant 0 : i32
    %c0_i32_0 = arith.constant 0 : i32
    %c0_i32_1 = arith.constant 0 : i32
    return %arg0, %c0_i32, %c0_i32_0 : i32, i32, i32
  }
  func.func @transform_2(%arg0: i32) -> (i32, i32) {
    %c0_i32 = arith.constant 0 : i32
    %c0_i32_0 = arith.constant 0 : i32
    %c0_i32_1 = arith.constant 0 : i32
    return %c0_i32, %c0_i32_0 : i32, i32
  }
  func.func @transform_3(%arg0: i32) -> (i32, i32) {
    %c0_i32 = arith.constant 0 : i32
    %c0_i32_0 = arith.constant 0 : i32
    %c0_i32_1 = arith.constant 0 : i32
    return %c0_i32, %c0_i32_0 : i32, i32
  }
  func.func @transform_4(%arg0: i32) -> (i32, i32, i32) {
    %c0_i32 = arith.constant 0 : i32
    %c0_i32_0 = arith.constant 0 : i32
    %c0_i32_1 = arith.constant 0 : i32
    return %arg0, %c0_i32, %c0_i32_0 : i32, i32, i32
  }
}

</mosaic_0001>

<bundles_post_ra>
// kernel: forward.1
= control target key start
LH: loop header
LB: loop body
LE: loop exit
PB: predicated region body
PF: predicated region fallthrough
CT: control target
= control target key end

     0   :  { %v405_v0 = vmov 0   ;;  %vm198_vm0 = vcmask 64512   ;;  %vm321_vm1 = vcmask 261120   ;;  %s511_s3 = inlined_call_operand.vmem [shape: f32[32,1], index: 3, kind: input, shape index: {}, may-alias: {2,3}]   ;;  %s512_s2 = inlined_call_operand.vmem [shape: f32[32,1], index: 2, kind: input, shape index: {}, may-alias: {2,3}]   ;;  %s513_s1 = inlined_call_operand.vmem [shape: f32[2,1,8], index: 1, kind: input, shape index: {}]   ;;  %s514_s0 = inlined_call_operand.vmem [shape: f32[2,1,8], index: 0, kind: input, shape index: {}]   ;;  %s515_s4 = inlined_call_operand.vmem [shape: f32[2,32,32], index: 4, kind: output, shape index: {}]  }
   0x1   :  { %372 = vset.pattern.permute.xlu1 %v405_v0  ;;  %371 = vset.pattern.permute.xlu0 %v405_v0  ;;  %v24_v1 = vld [vmem:[%s511_s3 + $0x10] sm:$0xff]  ;;  %v22_v2 = vld [vmem:[%s511_s3] sm:$0xff]  ;;  %v25_v3 = vld [vmem:[%s511_s3 + $0x18] sm:$0xff] }
   0x2   :  { %82 = vperm.xlu0 %371, %v24_v1   ;;  %72 = vperm.xlu1 %372, %v22_v2   ;;  %v23_v4 = vld [vmem:[%s511_s3 + $0x8] sm:$0xff]  ;;  %v18_v6 = vld [vmem:[%s512_s2] sm:$0xff]  ;;  %v21_v7 = vld [vmem:[%s512_s2 + $0x18] sm:$0xff] }
   0x3   :  { %v19_v5 = vld [vmem:[%s512_s2 + $0x8] sm:$0xff]  ;;  %v20_v8 = vld [vmem:[%s512_s2 + $0x10] sm:$0xff]  ;;  %v336_v9 = vld [vmem:[%s513_s1] ss:$0 sm:$0xff] }
   0x4   :  { %v337_v10 = vld [vmem:[%s513_s1 + $0x1] ss:$0 sm:$0xff]  ;;  %v334_v39 = vld [vmem:[%s514_s0] ss:$0 sm:$0xff] }
   0x5   :  { %v335_v40 = vld [vmem:[%s514_s0 + $0x1] ss:$0 sm:$0xff] }
   0x6   :  { %87 = vperm.xlu0 %371, %v25_v3   ;;  %77 = vperm.xlu1 %372, %v23_v4  }
   0xa   :  { %37 = vperm.xlu1 %372, %v19_v5   ;;  %32 = vperm.xlu0 %371, %v18_v6  }
   0xe   :  { %47 = vperm.xlu1 %372, %v21_v7   ;;  %42 = vperm.xlu0 %371, %v20_v8  }
  0x7d   :  { %v83_v11 = vpop.permute.xlu0 %82  ;;  %v73_v12 = vpop.permute.xlu1 %72 }
  0x7e   :  { %v104_v13 = vsub.f32 %v83_v11, %v336_v9  ;;  %v108_v14 = vsub.f32 %v83_v11, %v337_v10  ;;  %v102_v15 = vsub.f32 %v73_v12, %v336_v9  ;;  %v106_v16 = vsub.f32 %v73_v12, %v337_v10 }
  0x80   :  { %v156_v17 = vmul.f32 %v104_v13, %v104_v13  ;;  %v160_v18 = vmul.f32 %v108_v14, %v108_v14  ;;  %v154_v19 = vmul.f32 %v102_v15, %v102_v15  ;;  %v158_v20 = vmul.f32 %v106_v16, %v106_v16 }
  0x81   :  { %v88_v21 = vpop.permute.xlu0 %87  ;;  %v78_v22 = vpop.permute.xlu1 %77 }
  0x82   :  { %v164_v23 = vsub.f32 0.0, %v156_v17  ;;  %v168_v24 = vsub.f32 0.0, %v160_v18  ;;  %v162_v25 = vsub.f32 0.0, %v154_v19  ;;  %v166_v26 = vsub.f32 0.0, %v158_v20 }
  0x83   :  { %v105_v27 = vsub.f32 %v88_v21, %v336_v9  ;;  %v109_v28 = vsub.f32 %v88_v21, %v337_v10  ;;  %v103_v29 = vsub.f32 %v78_v22, %v336_v9  ;;  %v107_v30 = vsub.f32 %v78_v22, %v337_v10 }
  0x84   :  { %v172_v31 = vmul.f32 22.222221, %v164_v23  ;;  %v176_v32 = vmul.f32 22.222221, %v168_v24  ;;  %v170_v33 = vmul.f32 22.222221, %v162_v25 }
  0x85   :  { %v174_v34 = vmul.f32 22.222221, %v166_v26  ;;  %v157_v35 = vmul.f32 %v105_v27, %v105_v27  ;;  %v161_v36 = vmul.f32 %v109_v28, %v109_v28  ;;  %v155_v37 = vmul.f32 %v103_v29, %v103_v29  ;;  %v38_v38 = vpop.permute.xlu1 %37  ;;  %v33_v52 = vpop.permute.xlu0 %32 }
  0x86   :  { %v182_v41 = vmul.f32 1.442695, %v172_v31  ;;  %v190_v42 = vmul.f32 1.442695, %v176_v32  ;;  %v178_v43 = vmul.f32 1.442695, %v170_v33  ;;  %v159_v44 = vmul.f32 %v107_v30, %v107_v30 }
  0x87   :  { %v186_v45 = vmul.f32 1.442695, %v174_v34  ;;  %v165_v46 = vsub.f32 0.0, %v157_v35  ;;  %v169_v47 = vsub.f32 0.0, %v161_v36  ;;  %v163_v48 = vsub.f32 0.0, %v155_v37 }
  0x88   :  { %373 = vpow2.f32 %v182_v41  ;;  %v167_v49 = vsub.f32 0.0, %v159_v44  ;;  %v63_v50 = vsub.f32 %v38_v38, %v334_v39  ;;  %v67_v51 = vsub.f32 %v38_v38, %v335_v40 }
  0x89   :  { %375 = vpow2.f32 %v190_v42  ;;  %v173_v53 = vmul.f32 22.222221, %v165_v46  ;;  %v177_v54 = vmul.f32 22.222221, %v169_v47  ;;  %v171_v55 = vmul.f32 22.222221, %v163_v48  ;;  %v48_v59 = vpop.permute.xlu1 %47  ;;  %v43_v9 = vpop.permute.xlu0 %42 }
  0x8a   :  { %377 = vpow2.f32 %v178_v43  ;;  %v175_v56 = vmul.f32 22.222221, %v167_v49  ;;  %v111_v57 = vmul.f32 %v63_v50, %v63_v50  ;;  %v115_v58 = vmul.f32 %v67_v51, %v67_v51 }
  0x8b   :  { %379 = vpow2.f32 %v186_v45  ;;  %v184_v60 = vmul.f32 1.442695, %v173_v53  ;;  %v192_v61 = vmul.f32 1.442695, %v177_v54  ;;  %v180_v62 = vmul.f32 1.442695, %v171_v55 }
  0x8c   :  { %v188_v63 = vmul.f32 1.442695, %v175_v56  ;;  %v119_v0 = vsub.f32 0.0, %v111_v57  ;;  %v123_v1 = vsub.f32 0.0, %v115_v58  ;;  %v62_v2 = vsub.f32 %v33_v52, %v334_v39 }
  0x8d   :  { %381 = vpow2.f32 %v184_v60  ;;  %v66_v3 = vsub.f32 %v33_v52, %v335_v40  ;;  %v65_v4 = vsub.f32 %v48_v59, %v334_v39  ;;  %v69_v5 = vsub.f32 %v48_v59, %v335_v40 }
  0x8e   :  { %383 = vpow2.f32 %v192_v61  ;;  %v127_v6 = vmul.f32 22.222221, %v119_v0  ;;  %v131_v7 = vmul.f32 22.222221, %v123_v1  ;;  %v110_v8 = vmul.f32 %v62_v2, %v62_v2 }
  0x8f   :  { %385 = vpow2.f32 %v180_v62  ;;  %v114_v10 = vmul.f32 %v66_v3, %v66_v3  ;;  %v113_v11 = vmul.f32 %v65_v4, %v65_v4  ;;  %v117_v12 = vmul.f32 %v69_v5, %v69_v5 }
  0x90   :  { %387 = vpow2.f32 %v188_v63  ;;  %v136_v13 = vmul.f32 1.442695, %v127_v6  ;;  %v144_v14 = vmul.f32 1.442695, %v131_v7  ;;  %v118_v15 = vsub.f32 0.0, %v110_v8 }
  0x91   :  { %v122_v16 = vsub.f32 0.0, %v114_v10  ;;  %v121_v17 = vsub.f32 0.0, %v113_v11  ;;  %v125_v18 = vsub.f32 0.0, %v117_v12  ;;  %v64_v19 = vsub.f32 %v43_v9, %v334_v39 }
  0x92   :  { %v126_v20 = vmul.f32 22.222221, %v118_v15  ;;  %v68_v21 = vsub.f32 %v43_v9, %v335_v40  ;;  %389 = vpow2.f32 %v136_v13 }
  0x93   :  { %v130_v22 = vmul.f32 22.222221, %v122_v16  ;;  %v129_v23 = vmul.f32 22.222221, %v121_v17  ;;  %v133_v24 = vmul.f32 22.222221, %v125_v18  ;;  %v112_v26 = vmul.f32 %v64_v19, %v64_v19 }
  0x94   :  { %v134_v25 = vmul.f32 1.442695, %v126_v20  ;;  %v116_v27 = vmul.f32 %v68_v21, %v68_v21  ;;  %391 = vpow2.f32 %v144_v14 }
  0x95   :  { %v374_v28 = vpop.eup %373  ;;  %v142_v29 = vmul.f32 1.442695, %v130_v22  ;;  %v140_v31 = vmul.f32 1.442695, %v129_v23  ;;  %v120_v32 = vsub.f32 0.0, %v112_v26 }
  0x96   :  { %v376_v30 = vpop.eup %375  ;;  %393 = vpow2.f32 %v134_v25  ;;  %v124_v33 = vsub.f32 0.0, %v116_v27  ;;  %v148_v35 = vmul.f32 1.442695, %v133_v24 }
  0x97   :  { %v378_v34 = vpop.eup %377  ;;  %395 = vpow2.f32 %v142_v29  ;;  %v128_v37 = vmul.f32 22.222221, %v120_v32 }
  0x98   :  { %v380_v36 = vpop.eup %379  ;;  %v132_v38 = vmul.f32 22.222221, %v124_v33  ;;  %397 = vpow2.f32 %v140_v31 }
  0x99   :  { %v138_v40 = vmul.f32 1.442695, %v128_v37  ;;  %399 = vpow2.f32 %v148_v35 }
  0x9a   :  { %v382_v39 = vpop.eup %381  ;;  %v146_v41 = vmul.f32 1.442695, %v132_v38 }
  0x9b   :  { %v384_v42 = vpop.eup %383  ;;  %v195_v43 = vpack.c.bf16 %v382_v39, %v374_v28  ;;  %401 = vpow2.f32 %v138_v40 }
  0x9c   :  { %v386_v44 = vpop.eup %385  ;;  %v197_v45 = vpack.c.bf16 %v384_v42, %v376_v30  ;;  %403 = vpow2.f32 %v146_v41 }
  0x9d   :  { %v388_v46 = vpop.eup %387  ;;  %366 = vmatprep.subr.msk.bf16.mxu0 %vm198_vm0, %v195_v43  ;;  %v209_v47 = vsel %vm198_vm0, %v195_v43, 0  ;;  %v194_v48 = vpack.c.bf16 %v386_v44, %v378_v34 }
  0x9e   :  { %368 = vmatprep.subr.msk.bf16.mxu1 %vm198_vm0, %v197_v45  ;;  %351 = vmatpush3.bf16.xpose.msra.mxu0 %v209_v47  ;;  %v270_v49 = vsel %vm198_vm0, %v197_v45, 0  ;;  %v196_v50 = vpack.c.bf16 %v388_v46, %v380_v36 }
  0x9f   :  { %359 = vmatpush3.bf16.xpose.msra.mxu1 %v270_v49  ;;  %367 = vmatprep.subr.msk.bf16.mxu0 %vm198_vm0, %v194_v48  ;;  %v390_v51 = vpop.eup %389  ;;  %v206_v57 = vsel %vm198_vm0, %v194_v48, 0 }
  0xa0   :  { %369 = vmatprep.subr.msk.bf16.mxu1 %vm198_vm0, %v196_v50  ;;  %v267_v58 = vsel %vm198_vm0, %v196_v50, 0 }
  0xa1   :  { %v392_v52 = vpop.eup %391 }
  0xa3   :  { %v394_v53 = vpop.eup %393 }
  0xa4   :  { %v396_v54 = vpop.eup %395  ;;  %v150_v55 = vpack.c.bf16 %v390_v51, %v394_v53 }
  0xa5   :  { %v152_v56 = vpack.c.bf16 %v392_v52, %v396_v54  ;;  %v398_v59 = vpop.eup %397 }
  0xa6   :  { %354 = vmatprep.mubr.msk.bf16.mxu0 %vm198_vm0, %v150_v55  ;;  %353 = vmatpush3.bf16.xpose.msra.mxu0 %v206_v57  ;;  %v400_v60 = vpop.eup %399 }
  0xa7   :  { %362 = vmatprep.mubr.msk.bf16.mxu1 %vm198_vm0, %v152_v56  ;;  %361 = vmatpush3.bf16.xpose.msra.mxu1 %v267_v58 }
  0xa8   :  { %v402_v61 = vpop.eup %401 }
  0xa9   :  { %v404_v62 = vpop.eup %403  ;;  %v151_v63 = vpack.c.bf16 %v398_v59, %v402_v61 }
  0xaa   :  { %v153_v0 = vpack.c.bf16 %v400_v60, %v404_v62 }
  0xad   :  { %355 = vmatmul.mubr.msk.bf16.vlgmr.msra.gmra.mxu0 %vm198_vm0, %v151_v63 }
  0xae   :  { %363 = vmatmul.mubr.msk.bf16.vlgmr.msra.gmra.mxu1 %vm198_vm0, %v153_v0 }
 0x16d   :  { %v356_v1 = vpop.f32.mrf.mxu0 }
 0x16e   :  { %324 = vst.msk [vmem:[%s515_s4 + $0x10] sm:$0xff] %vm321_vm1, %v356_v1  ;;  %v364_v2 = vpop.f32.mrf.mxu1 }
 0x16f   :  { %328 = vst.msk [vmem:[%s515_s4 + $0x30] sm:$0xff] %vm321_vm1, %v364_v2  ;;  %v245_v3 = vpop.f32.mrf.mxu0 }
 0x170   :  { %322 = vst.msk [vmem:[%s515_s4] sm:$0xff] %vm321_vm1, %v245_v3  ;;  %v306_v4 = vpop.f32.mrf.mxu1 }
 0x171   :  { %326 = vst.msk [vmem:[%s515_s4 + $0x20] sm:$0xff] %vm321_vm1, %v306_v4  ;;  %v357_v5 = vpop.f32.mrf.mxu0 }
 0x172   :  { %325 = vst.msk [vmem:[%s515_s4 + $0x18] sm:$0xff] %vm321_vm1, %v357_v5  ;;  %v365_v6 = vpop.f32.mrf.mxu1 }
 0x173   :  { %329 = vst.msk [vmem:[%s515_s4 + $0x38] sm:$0xff] %vm321_vm1, %v365_v6  ;;  %v248_v7 = vpop.f32.mrf.mxu0 }
 0x174   :  { %323 = vst.msk [vmem:[%s515_s4 + $0x8] sm:$0xff] %vm321_vm1, %v248_v7  ;;  %v309_v8 = vpop.f32.mrf.mxu1 }
 0x175   :  { %327 = vst.msk [vmem:[%s515_s4 + $0x28] sm:$0xff] %vm321_vm1, %v309_v8 }

</bundles_post_ra>
